<compile_context>
chip_gen: v7x
topology: tpu7x:2x2x1
jax: 0.10.0
libtpu: 0.0.40
codegen_flags: <defaults>
</compile_context>

<pallas_src>
import functools

import jax
import jax.numpy as jnp
from jax.experimental import pallas as pl
from jax.experimental.pallas import tpu as pltpu

LANES = 128
SUBLANES = 8
MAX_TILE_ROWS = 4096  # 4096 * 128 * 4 B = 2 MiB per f32 input tile


def _neg_formula(pred_f32, gt_f32):
    g = 1.0 - gt_f32
    g2 = g * g
    return jnp.log(1.0 - pred_f32) * (pred_f32 * pred_f32) * (g2 * g2)


def _neg_loss_sum(out, target, max_tile_rows=MAX_TILE_ROWS):
    """f32 sum over all elements of log(1 - out) * out^2 * (1 - target)^4."""
    flat_o = out.reshape(-1)
    flat_t = target.reshape(-1)
    n = flat_o.shape[0]

    # Sub-32-bit dtypes pack along sublanes: keep row blocks a multiple of the
    # packed sublane count (8 f32 / 16 bf16 / 32 int8-fp8).
    pack = max(1, 4 // min(jnp.dtype(out.dtype).itemsize,
                           jnp.dtype(target.dtype).itemsize))
    row_align = SUBLANES * pack
    chunk = row_align * LANES

    bulk = (n // chunk) * chunk  # elements handled by the kernel

    # < chunk leftover elements: plain jnp (XLA fuses it; negligible bytes).
    tail_sum = jnp.float32(0.0)
    if bulk < n:
        # NOTE: on this (rare, unaligned) path XLA also materializes the prefix
        # slice that feeds the kernel; still cheaper than the old jnp.pad path.
        tail_sum = jnp.sum(
            _neg_formula(flat_o[bulk:].astype(jnp.float32),
                         flat_t[bulk:].astype(jnp.float32)))

    if bulk == 0:
        return tail_sum

    rows = bulk // LANES  # multiple of row_align
    tile_rows = min(max_tile_rows, rows)
    tile_rows = max(row_align, (tile_rows // row_align) * row_align)
    num_tiles = pl.cdiv(rows, tile_rows)
    ragged = (rows % tile_rows) != 0  # static

    if bulk < n:
        o_bulk = flat_o[:bulk]
        t_bulk = flat_t[:bulk]
    else:
        o_bulk, t_bulk = flat_o, flat_t
    o2 = o_bulk.reshape(rows, LANES)  # zero-copy when bulk == n
    t2 = t_bulk.reshape(rows, LANES)

    k = tile_rows // SUBLANES  # number of (8,128) vregs per tile

    def reduce_tile(contrib):
        # Fold (tile_rows, 128) -> (8, 128).  Split into 4 independent
        # accumulator chains when possible so the 4 VALU slots are not
        # serialized on one long dependent add chain.
        if k % 4 == 0 and k >= 8:
            c4 = contrib.reshape(4, k // 4, SUBLANES, LANES)
            s0 = c4[0].sum(axis=0)
            s1 = c4[1].sum(axis=0)
            s2 = c4[2].sum(axis=0)
            s3 = c4[3].sum(axis=0)
            return (s0 + s1) + (s2 + s3)
        return contrib.reshape(k, SUBLANES, LANES).sum(axis=0)

    def kernel(o_ref, t_ref, part_ref):
        # Upcast in registers only; HBM traffic stays in the native dtype.
        pred = o_ref[...].astype(jnp.float32)
        gt = t_ref[...].astype(jnp.float32)
        contrib = _neg_formula(pred, gt)

        if not ragged:
            part_ref[...] = reduce_tile(contrib)
        else:
            i = pl.program_id(0)

            @pl.when(i < num_tiles - 1)
            def _():
                part_ref[...] = reduce_tile(contrib)

            @pl.when(i == num_tiles - 1)
            def _():
                # Last (ragged) tile: drop rows past the array end.  where()
                # SELECTS, so NaN/Inf computed from the unspecified
                # out-of-bounds values never reaches the sum.
                local_rows = jax.lax.broadcasted_iota(
                    jnp.int32, (tile_rows, LANES), 0)
                valid = local_rows < (rows - i * tile_rows)
                part_ref[...] = reduce_tile(jnp.where(valid, contrib, 0.0))

    tile_spec = pl.BlockSpec((tile_rows, LANES), lambda i: (i, 0))
    partials = pl.pallas_call(
        kernel,
        out_shape=jax.ShapeDtypeStruct((num_tiles * SUBLANES, LANES),
                                       jnp.float32),
        grid_spec=pltpu.PrefetchScalarGridSpec(
            num_scalar_prefetch=0,
            grid=(num_tiles,),
            in_specs=[tile_spec, tile_spec],
            out_specs=pl.BlockSpec((SUBLANES, LANES), lambda i: (i, 0)),
        ),
        compiler_params=pltpu.CompilerParams(
            dimension_semantics=("parallel",),
            vmem_limit_bytes=48 * 1024 * 1024,
        ),
    )(o2, t2)

    # Tiny epilogue reduce (num_tiles * 8 * 128 partials).
    return jnp.sum(partials) + tail_sum


def fast_focal_loss(out, target, ind, mask, cat, max_tile_rows=MAX_TILE_ROWS):
    """Pallas implementation of FastFocalLoss.forward."""
    B, C, H, W = out.shape
    maskf = mask.astype(jnp.float32)

    # HBM-heavy negative part: Pallas kernel over all B*C*H*W pixels.
    neg_loss = _neg_loss_sum(out, target, max_tile_rows)

    # O(B*M) positive part: data-dependent peak gather + two tiny sums, kept in
    # plain jnp (a dedicated pallas_call here is pure launch overhead).
    # TODO(synk): a scalar-prefetch Pallas gather kernel would add one DMA per
    # peak for negligible gain over XLA's fused gather.
    out_flat = out.reshape(B, C, H * W)
    b_idx = jnp.arange(B)[:, None]
    pos_pred = out_flat[b_idx, cat, ind].astype(jnp.float32)  # (B, M)

    num_pos = jnp.sum(maskf)
    # where() gates masked-out slots so a zero-valued gathered pixel on a
    # padded detection cannot inject NaN (log(0) * 0); identical result to the
    # PyTorch formula for all non-degenerate inputs.
    pos_loss = jnp.sum(
        jnp.where(maskf > 0,
                  jnp.log(pos_pred) * jnp.square(1.0 - pos_pred) * maskf,
                  0.0))

    denom = jnp.where(num_pos > 0, num_pos, 1.0)
    return jnp.where(num_pos > 0, -(pos_loss + neg_loss) / denom, -neg_loss)


def _reference(out, target, ind, mask, cat):
    """Pure-JAX reference (mirrors the PyTorch module)."""
    out = out.astype(jnp.float32)
    target = target.astype(jnp.float32)
    mask = mask.astype(jnp.float32)
    B, C, H, W = out.shape
    neg = jnp.sum(jnp.log(1.0 - out) * out ** 2 * (1.0 - target) ** 4)
    pos_pred = out.reshape(B, C, H * W)[jnp.arange(B)[:, None], cat, ind]
    num_pos = jnp.sum(mask)
    pos = jnp.sum(jnp.log(pos_pred) * (1.0 - pos_pred) ** 2 * mask)
    return jnp.where(num_pos > 0,
                     -(pos + neg) / jnp.where(num_pos > 0, num_pos, 1.0),
                     -neg)


if __name__ == "__main__":
    key = jax.random.PRNGKey(0)
    k_o, k_t, k_i, k_m, k_c = jax.random.split(key, 5)

    # Case 1: small f32 inputs, fully (8*128)-aligned, single tile.
    B, C, H, W, M = 2, 4, 16, 16, 8
    out = jax.nn.sigmoid(jax.random.normal(k_o, (B, C, H, W), dtype=jnp.float32))
    target = jax.random.uniform(k_t, (B, C, H, W), dtype=jnp.float32)
    ind = jax.random.randint(k_i, (B, M), 0, H * W, dtype=jnp.int32)
    cat = jax.random.randint(k_c, (B, M), 0, C, dtype=jnp.int32)
    mask = (jax.random.uniform(k_m, (B, M)) > 0.5).astype(jnp.float32)

    loss = jax.block_until_ready(
        jax.jit(fast_focal_loss)(out, target, ind, mask, cat))
    expected = _reference(out, target, ind, mask, cat)
    assert jnp.allclose(loss, expected, rtol=1e-4, atol=1e-4), (loss, expected)

    # Case 2: bf16 inputs (native-dtype ingestion, in-kernel upcast).
    loss_bf = jax.block_until_ready(
        jax.jit(fast_focal_loss)(out.astype(jnp.bfloat16),
                                 target.astype(jnp.bfloat16), ind, mask, cat))
    expected_bf = _reference(out.astype(jnp.bfloat16),
                             target.astype(jnp.bfloat16), ind, mask, cat)
    assert jnp.allclose(loss_bf, expected_bf, rtol=1e-3, atol=1e-3), (
        loss_bf, expected_bf)

    # Case 3: unaligned element tail + multi-tile ragged grid + 4-way in-tile
    # reduce (exercised by shrinking max_tile_rows).
    H2 = W2 = 40
    k_o2, k_t2, k_i2 = jax.random.split(k_o, 3)
    out2 = jax.nn.sigmoid(
        jax.random.normal(k_o2, (B, C, H2, W2), dtype=jnp.float32))
    target2 = jax.random.uniform(k_t2, (B, C, H2, W2), dtype=jnp.float32)
    ind2 = jax.random.randint(k_i2, (B, M), 0, H2 * W2, dtype=jnp.int32)
    fn2 = jax.jit(functools.partial(fast_focal_loss, max_tile_rows=64))
    loss2 = jax.block_until_ready(fn2(out2, target2, ind2, mask, cat))
    expected2 = _reference(out2, target2, ind2, mask, cat)
    assert jnp.allclose(loss2, expected2, rtol=1e-4, atol=1e-4), (
        loss2, expected2)

    print("KERNEL_OK")
</pallas_src>

<mosaic_0001>
module attributes {stable_mosaic.version = 11 : i64} {
  func.func @kernel(%arg0: i32, %arg1: memref<16x128xf32, #tpu.memory_space<vmem>>, %arg2: memref<16x128xf32, #tpu.memory_space<vmem>>, %arg3: memref<8x128xf32, #tpu.memory_space<vmem>>) attributes {dimension_semantics = [#tpu.dimension_semantics<parallel>], iteration_bounds = array<i64: 1>, scalar_prefetch = 0 : i64, scratch_operands = 0 : i64, tpu.core_type = #tpu.core_type<tc>, window_params = [{transform_indices = @transform_0, window_bounds = array<i64: 16, 128>}, {transform_indices = @transform_1, window_bounds = array<i64: 16, 128>}, {transform_indices = @transform_2, window_bounds = array<i64: 8, 128>}]} {
    %c0 = arith.constant 0 : index
    %c0_0 = arith.constant 0 : index
    %0 = vector.load %arg1[%c0, %c0_0] : memref<16x128xf32, #tpu.memory_space<vmem>>, vector<16x128xf32>
    %c0_1 = arith.constant 0 : index
    %c0_2 = arith.constant 0 : index
    %1 = vector.load %arg2[%c0_1, %c0_2] : memref<16x128xf32, #tpu.memory_space<vmem>>, vector<16x128xf32>
    %cst = arith.constant 1.000000e+00 : f32
    %2 = vector.broadcast %cst : f32 to vector<16x128xf32>
    %3 = arith.subf %2, %1 : vector<16x128xf32>
    %4 = arith.mulf %3, %3 : vector<16x128xf32>
    %cst_3 = arith.constant 1.000000e+00 : f32
    %5 = vector.broadcast %cst_3 : f32 to vector<16x128xf32>
    %6 = arith.subf %5, %0 : vector<16x128xf32>
    %7 = math.log %6 : vector<16x128xf32>
    %8 = arith.mulf %0, %0 : vector<16x128xf32>
    %9 = arith.mulf %7, %8 : vector<16x128xf32>
    %10 = arith.mulf %4, %4 : vector<16x128xf32>
    %11 = arith.mulf %9, %10 : vector<16x128xf32>
    %12 = vector.shape_cast %11 : vector<16x128xf32> to vector<2x8x128xf32>
    %cst_4 = arith.constant dense<0.000000e+00> : vector<8x128xf32>
    %13 = vector.multi_reduction <add>, %12, %cst_4 [0] : vector<2x8x128xf32> to vector<8x128xf32>
    %c0_5 = arith.constant 0 : index
    %c0_6 = arith.constant 0 : index
    %14 = vector.load %arg3[%c0_5, %c0_6] : memref<8x128xf32, #tpu.memory_space<vmem>>, vector<8x128xf32>
    tpu.vector_store %arg3[%c0_5, %c0_6], %13 {strides = array<i32>} : memref<8x128xf32, #tpu.memory_space<vmem>>, vector<8x128xf32>,
    return
  }
  func.func @transform_0(%arg0: i32) -> (i32, i32) {
    %c0_i32 = arith.constant 0 : i32
    %c0_i32_0 = arith.constant 0 : i32
    return %arg0, %c0_i32 : i32, i32
  }
  func.func @transform_1(%arg0: i32) -> (i32, i32) {
    %c0_i32 = arith.constant 0 : i32
    %c0_i32_0 = arith.constant 0 : i32
    return %arg0, %c0_i32 : i32, i32
  }
  func.func @transform_2(%arg0: i32) -> (i32, i32) {
    %c0_i32 = arith.constant 0 : i32
    %c0_i32_0 = arith.constant 0 : i32
    return %arg0, %c0_i32 : i32, i32
  }
}

</mosaic_0001>

<bundles_post_ra>
// kernel: fast_focal_loss.1
= control target key start
LH: loop header
LB: loop body
LE: loop exit
PB: predicated region body
PF: predicated region fallthrough
CT: control target
= control target key end

     0   :  { %s73_s0 = inlined_call_operand.vmem [shape: f32[16,128], index: 0, kind: input, shape index: {}]   ;;  %s74_s1 = inlined_call_operand.vmem [shape: f32[16,128], index: 1, kind: input, shape index: {}]   ;;  %s75_s2 = inlined_call_operand.vmem [shape: f32[8,128], index: 2, kind: output, shape index: {}]  }
   0x1   :  { %v11_v0 = vld [vmem:[%s73_s0] sm:$0xff]  ;;  %v12_v1 = vld [vmem:[%s73_s0 + $0x8] sm:$0xff] }
   0x2   :  { %v19_v2 = vsub.f32 1.0, %v11_v0  ;;  %v20_v3 = vsub.f32 1.0, %v12_v1  ;;  %v13_v4 = vld [vmem:[%s74_s1] sm:$0xff]  ;;  %v14_v5 = vld [vmem:[%s74_s1 + $0x8] sm:$0xff]  ;;  %v25_v10 = vmul.f32 %v11_v0, %v11_v0  ;;  %v26_v12 = vmul.f32 %v12_v1, %v12_v1 }
   0x3   :  { %v15_v6 = vsub.f32 1.0, %v13_v4  ;;  %v16_v7 = vsub.f32 1.0, %v14_v5 }
   0x4   :  { %39 = vlog2.f32 %v19_v2 }
   0x5   :  { %41 = vlog2.f32 %v20_v3  ;;  %v17_v8 = vmul.f32 %v15_v6, %v15_v6  ;;  %v18_v9 = vmul.f32 %v16_v7, %v16_v7 }
   0x7   :  { %v29_v15 = vmul.f32 %v17_v8, %v17_v8  ;;  %v30_v17 = vmul.f32 %v18_v9, %v18_v9 }
   0xe   :  { %v40_v11 = vpop.eup %39 }
   0xf   :  { %v42_v13 = vpop.eup %41  ;;  %v22_v14 = vmul.f32 0.6931472, %v40_v11 }
  0x10   :  { %v24_v16 = vmul.f32 0.6931472, %v42_v13 }
  0x11   :  { %v27_v18 = vmul.f32 %v25_v10, %v22_v14 }
  0x12   :  { %v28_v19 = vmul.f32 %v26_v12, %v24_v16 }
  0x13   :  { %v31_v20 = vmul.f32 %v29_v15, %v27_v18 }
  0x14   :  { %v32_v21 = vmul.f32 %v30_v17, %v28_v19 }
  0x16   :  { %v33_v22 = vadd.f32 %v32_v21, %v31_v20 }
  0x18   :  { %34 = vst [vmem:[%s75_s2] sm:$0xff] %v33_v22 }

</bundles_post_ra>
